<compile_context>
chip_gen: v7x
topology: tpu7x:2x2x1
jax: 0.10.0
libtpu: 0.0.40
codegen_flags: <defaults>
</compile_context>

<pallas_src>
import math
import functools

import jax
import jax.numpy as jnp
from jax import lax
from jax.experimental import pallas as pl
from jax.experimental.pallas import tpu as pltpu

# ---- model config (small, deterministic) ----
N_EMBD = 32
N_HEAD = 4
BLOCK_SIZE = 8                    # max sequence length (T == BLOCK_SIZE below)
HEAD_DIM = N_EMBD // N_HEAD

NEG_INF = -1e30                   # finite "minus infinity": avoids -inf-(-inf)=NaN


def _tensorcores_per_chip() -> int:
    """Best-effort TC count; defaults to 1 (the safe choice on v5e/v6e)."""
    try:
        info = pltpu.get_tpu_info()
        for name in ("num_cores", "num_tensorcores", "tensorcores_per_chip",
                     "cores_per_chip", "core_count"):
            n = getattr(info, name, None)
            if n is not None:
                return max(1, int(n))
    except Exception:
        pass
    return 1


_NUM_TC = _tensorcores_per_chip()


def causal_attn_kernel(x_ref, wqkv_ref, bqkv_ref, wproj_ref, bproj_ref, o_ref,
                       *, batch_block, seq_len, n_head):
    """One batch *block* (bb batch elements, flattened to rows) per grid step.

    x_ref:     (bb*T, C)   flattened rows of this block's batch elements
    wqkv_ref:  (C, 3C)     c_attn weight ; bqkv_ref: (1, 3C)
    wproj_ref: (C, C)      c_proj weight ; bproj_ref: (1, C)
    o_ref:     (bb*T, C)
    """
    bb, T, nh = batch_block, seq_len, n_head
    rows, C = x_ref.shape
    hd = C // nh
    scale = 1.0 / math.sqrt(hd)
    dt = x_ref.dtype                              # MXU operand dtype (bf16-friendly)

    # ---- fused QKV projection: one (rows, C) @ (C, 3C) matmul over all rows ----
    qkv = jnp.dot(x_ref[...], wqkv_ref[...],
                  preferred_element_type=jnp.float32)
    qkv = qkv + bqkv_ref[...].astype(jnp.float32)

    # Fold 1/sqrt(hd) into q once (in f32), then cast MXU operands back to the
    # input dtype; only the softmax chain below stays in f32.
    q = (qkv[:, 0 * C:1 * C] * scale).astype(dt)
    k = qkv[:, 1 * C:2 * C].astype(dt)
    v = qkv[:, 2 * C:3 * C].astype(dt)

    def to_heads(t):                              # (rows, C) -> (bb*nh, T, hd)
        t = t.reshape(bb, T, nh, hd)
        t = jnp.swapaxes(t, 1, 2)                 # (bb, nh, T, hd), minor dim kept
        return t.reshape(bb * nh, T, hd)

    qh, kh, vh = to_heads(q), to_heads(k), to_heads(v)

    # ---- attention scores with a real (batch*head) batch axis ----
    att = jnp.einsum('gqd,gkd->gqk', qh, kh,
                     preferred_element_type=jnp.float32)          # (bb*nh, T, T)

    # Causal mask (T, T), broadcast over batch*head.
    r_idx = lax.broadcasted_iota(jnp.int32, (T, T), 0)
    s_idx = lax.broadcasted_iota(jnp.int32, (T, T), 1)
    att = jnp.where((r_idx >= s_idx)[None], att, NEG_INF)

    # Softmax in f32, exact normalization (not EUP-bound at this size).
    att = att - jnp.max(att, axis=-1, keepdims=True)
    e = jnp.exp(att)
    p = e / jnp.sum(e, axis=-1, keepdims=True)

    y = jnp.einsum('gqk,gkd->gqd', p.astype(dt), vh,
                   preferred_element_type=jnp.float32)            # (bb*nh, T, hd)

    # ---- re-concatenate heads, then ONE output-projection matmul ----
    y = jnp.swapaxes(y.reshape(bb, nh, T, hd), 1, 2).reshape(rows, C).astype(dt)
    out = jnp.dot(y, wproj_ref[...], preferred_element_type=jnp.float32)
    out = out + bproj_ref[...].astype(jnp.float32)

    o_ref[...] = out.astype(o_ref.dtype)


@jax.jit
def causal_self_attention(x, w_qkv, b_qkv, w_proj, b_proj):
    B, T, C = x.shape
    nh = N_HEAD

    # One grid step on single-TC chips (v5e/v6e); 2-way "parallel" split only
    # when the chip reports >=2 TensorCores (v7x) and the batch divides evenly.
    nb = 2 if (_NUM_TC >= 2 and B >= 2 and B % 2 == 0) else 1
    bb = B // nb
    rows = bb * T

    x2 = x.reshape(B * T, C)                     # wrapper-side (free) flatten

    kernel = functools.partial(causal_attn_kernel,
                               batch_block=bb, seq_len=T, n_head=nh)

    # Advisory cost hint so XLA schedules the tiny custom call sensibly.
    hd = C // nh
    flops = (2 * B * T * C * 3 * C               # QKV projection
             + 2 * B * nh * T * T * hd * 2       # q @ k^T and att @ v
             + 2 * B * T * C * C)                # output projection
    transcendentals = B * nh * T * T             # exp in softmax
    itemsize = x.dtype.itemsize
    bytes_accessed = ((2 * B * T * C) * itemsize
                      + (C * 3 * C + 3 * C + C * C + C) * itemsize)

    out = pl.pallas_call(
        kernel,
        out_shape=jax.ShapeDtypeStruct((B * T, C), x.dtype),
        grid_spec=pltpu.PrefetchScalarGridSpec(
            num_scalar_prefetch=0,
            grid=(nb,),
            in_specs=[
                pl.BlockSpec((rows, C), lambda b: (b, 0)),       # this block's rows
                pl.BlockSpec((C, 3 * C), lambda b: (0, 0)),      # c_attn weight
                pl.BlockSpec((1, 3 * C), lambda b: (0, 0)),      # c_attn bias
                pl.BlockSpec((C, C), lambda b: (0, 0)),          # c_proj weight
                pl.BlockSpec((1, C), lambda b: (0, 0)),          # c_proj bias
            ],
            out_specs=pl.BlockSpec((rows, C), lambda b: (b, 0)), # contiguous row slab
        ),
        compiler_params=pltpu.CompilerParams(
            dimension_semantics=("parallel",)),
        cost_estimate=pl.CostEstimate(flops=flops,
                                      transcendentals=transcendentals,
                                      bytes_accessed=bytes_accessed),
    )(x2, w_qkv, b_qkv, w_proj, b_proj)
    return out.reshape(B, T, C)


def reference(x, w_qkv, b_qkv, w_proj, b_proj):
    """Pure-JAX reference mirroring the PyTorch forward."""
    B, T, C = x.shape
    qkv = x @ w_qkv + b_qkv[0]
    q, k, v = jnp.split(qkv, 3, axis=-1)

    def heads(t):  # (B, T, C) -> (B, nh, T, hd)
        return t.reshape(B, T, N_HEAD, HEAD_DIM).transpose(0, 2, 1, 3)

    q, k, v = heads(q), heads(k), heads(v)
    att = (q @ jnp.swapaxes(k, -2, -1)) * (1.0 / math.sqrt(HEAD_DIM))
    mask = jnp.tril(jnp.ones((T, T), bool))
    att = jnp.where(mask[None, None], att, -jnp.inf)
    att = jax.nn.softmax(att, axis=-1)
    y = att @ v
    y = y.transpose(0, 2, 1, 3).reshape(B, T, C)
    return y @ w_proj + b_proj[0]


if __name__ == "__main__":
    key = jax.random.PRNGKey(0)
    k_x, k_w1, k_b1, k_w2, k_b2 = jax.random.split(key, 5)

    B, T, C = 2, BLOCK_SIZE, N_EMBD   # x: (2, 8, 32)
    x = jax.random.normal(k_x, (B, T, C), jnp.float32)

    # Deterministic parameter init (PyTorch Linear-style uniform bounds).
    bound1 = 1.0 / math.sqrt(C)
    w_qkv = jax.random.uniform(k_w1, (C, 3 * C), jnp.float32, -bound1, bound1)
    b_qkv = jax.random.uniform(k_b1, (1, 3 * C), jnp.float32, -bound1, bound1)
    w_proj = jax.random.uniform(k_w2, (C, C), jnp.float32, -bound1, bound1)
    b_proj = jax.random.uniform(k_b2, (1, C), jnp.float32, -bound1, bound1)

    y = causal_self_attention(x, w_qkv, b_qkv, w_proj, b_proj)
    jax.block_until_ready(y)

    y_ref = reference(x, w_qkv, b_qkv, w_proj, b_proj)
    assert y.shape == (B, T, C)
    # f32 inputs + exact softmax normalization -> tight parity with the reference;
    # any structural bug (wrong mask / head mixing) would produce O(1e-1) errors.
    assert jnp.allclose(y, y_ref, atol=1e-3, rtol=1e-3), "mismatch vs reference"

    print("KERNEL_OK")
</pallas_src>

<mosaic_0001>
module attributes {stable_mosaic.version = 11 : i64} {
  func.func @causal_attn_kernel(%arg0: i32, %arg1: memref<16x32xf32, #tpu.memory_space<vmem>>, %arg2: memref<32x96xf32, #tpu.memory_space<vmem>>, %arg3: memref<1x96xf32, #tpu.memory_space<vmem>>, %arg4: memref<32x32xf32, #tpu.memory_space<vmem>>, %arg5: memref<1x32xf32, #tpu.memory_space<vmem>>, %arg6: memref<16x32xf32, #tpu.memory_space<vmem>>) attributes {dimension_semantics = [#tpu.dimension_semantics<parallel>], iteration_bounds = array<i64: 1>, scalar_prefetch = 0 : i64, scratch_operands = 0 : i64, tpu.core_type = #tpu.core_type<tc>, window_params = [{transform_indices = @transform_0, window_bounds = array<i64: 16, 32>}, {pipeline_mode = #tpu.pipeline_mode<synchronous>, transform_indices = @transform_1, window_bounds = array<i64: 32, 96>}, {pipeline_mode = #tpu.pipeline_mode<synchronous>, transform_indices = @transform_2, window_bounds = array<i64: 1, 96>}, {pipeline_mode = #tpu.pipeline_mode<synchronous>, transform_indices = @transform_3, window_bounds = array<i64: 32, 32>}, {pipeline_mode = #tpu.pipeline_mode<synchronous>, transform_indices = @transform_4, window_bounds = array<i64: 1, 32>}, {transform_indices = @transform_5, window_bounds = array<i64: 16, 32>}]} {
    %c0 = arith.constant 0 : index
    %c0_0 = arith.constant 0 : index
    %0 = vector.load %arg1[%c0, %c0_0] : memref<16x32xf32, #tpu.memory_space<vmem>>, vector<16x32xf32>
    %c0_1 = arith.constant 0 : index
    %c0_2 = arith.constant 0 : index
    %1 = vector.load %arg2[%c0_1, %c0_2] : memref<32x96xf32, #tpu.memory_space<vmem>>, vector<32x96xf32>
    %cst = arith.constant dense<0.000000e+00> : vector<16x96xf32>
    %2 = tpu.matmul %0, %1, %cst {dimension_numbers = #tpu.dot_dimension_numbers<[1], [0], [0], [1], [0, 0, 1, 1], [], []>} : vector<16x32xf32>, vector<32x96xf32>, vector<16x96xf32> -> vector<16x96xf32>
    %c0_3 = arith.constant 0 : index
    %c0_4 = arith.constant 0 : index
    %3 = vector.load %arg3[%c0_3, %c0_4] : memref<1x96xf32, #tpu.memory_space<vmem>>, vector<1x96xf32>
    %4 = vector.broadcast %3 : vector<1x96xf32> to vector<16x96xf32>
    %5 = arith.addf %2, %4 : vector<16x96xf32>
    %6 = vector.extract_strided_slice %5 {offsets = [0, 0], sizes = [16, 32], strides = [1, 1]} : vector<16x96xf32> to vector<16x32xf32>
    %cst_5 = arith.constant 0.353553385 : f32
    %7 = vector.broadcast %cst_5 : f32 to vector<16x32xf32>
    %8 = arith.mulf %6, %7 : vector<16x32xf32>
    %9 = vector.extract_strided_slice %5 {offsets = [0, 32], sizes = [16, 32], strides = [1, 1]} : vector<16x96xf32> to vector<16x32xf32>
    %10 = vector.extract_strided_slice %5 {offsets = [0, 64], sizes = [16, 32], strides = [1, 1]} : vector<16x96xf32> to vector<16x32xf32>
    %11 = vector.shape_cast %8 : vector<16x32xf32> to vector<2x8x4x8xf32>
    %12 = tpu.transpose %11, [0, 2, 1, 3] : vector<2x8x4x8xf32> -> vector<2x4x8x8xf32>
    %13 = vector.shape_cast %12 : vector<2x4x8x8xf32> to vector<8x8x8xf32>
    %14 = vector.shape_cast %9 : vector<16x32xf32> to vector<2x8x4x8xf32>
    %15 = tpu.transpose %14, [0, 2, 1, 3] : vector<2x8x4x8xf32> -> vector<2x4x8x8xf32>
    %16 = vector.shape_cast %15 : vector<2x4x8x8xf32> to vector<8x8x8xf32>
    %17 = vector.shape_cast %10 : vector<16x32xf32> to vector<2x8x4x8xf32>
    %18 = tpu.transpose %17, [0, 2, 1, 3] : vector<2x8x4x8xf32> -> vector<2x4x8x8xf32>
    %19 = vector.shape_cast %18 : vector<2x4x8x8xf32> to vector<8x8x8xf32>
    "tpu.trace_start"() <{level = 10 : i32, message = "gqd,gkd->gqk"}> : () -> ()
    %cst_6 = arith.constant dense<0.000000e+00> : vector<8x8x8xf32>
    %20 = tpu.matmul %13, %16, %cst_6 {dimension_numbers = #tpu.dot_dimension_numbers<[2], [2], [1], [1], [0, 0, 0, 1, 1, 1], [0], [0]>} : vector<8x8x8xf32>, vector<8x8x8xf32>, vector<8x8x8xf32> -> vector<8x8x8xf32>
    "tpu.trace_stop"() : () -> ()
    %21 = tpu.iota {dimensions = array<i32: 0>} : vector<8x8xi32>
    %22 = tpu.iota {dimensions = array<i32: 1>} : vector<8x8xi32>
    %23 = arith.cmpi sge, %21, %22 : vector<8x8xi32>
    %24 = vector.shape_cast %23 : vector<8x8xi1> to vector<1x8x8xi1>
    %cst_7 = arith.constant -1.000000e+30 : f32
    %25 = vector.shape_cast %24 : vector<1x8x8xi1> to vector<1x8x8xi1>
    %26 = vector.broadcast %25 : vector<1x8x8xi1> to vector<8x8x8xi1>
    %27 = vector.broadcast %cst_7 : f32 to vector<8x8x8xf32>
    %28 = arith.select %26, %20, %27 : vector<8x8x8xi1>, vector<8x8x8xf32>
    %cst_8 = arith.constant dense<0xFF800000> : vector<8x8xf32>
    %29 = vector.multi_reduction <maximumf>, %28, %cst_8 [2] : vector<8x8x8xf32> to vector<8x8xf32>
    %30 = vector.shape_cast %29 : vector<8x8xf32> to vector<8x8x1xf32>
    %31 = vector.broadcast %30 : vector<8x8x1xf32> to vector<8x8x8xf32>
    %32 = arith.subf %28, %31 : vector<8x8x8xf32>
    %33 = math.exp %32 : vector<8x8x8xf32>
    %cst_9 = arith.constant dense<0.000000e+00> : vector<8x8xf32>
    %34 = vector.multi_reduction <add>, %33, %cst_9 [2] : vector<8x8x8xf32> to vector<8x8xf32>
    %35 = vector.shape_cast %34 : vector<8x8xf32> to vector<8x8x1xf32>
    %36 = vector.broadcast %35 : vector<8x8x1xf32> to vector<8x8x8xf32>
    %37 = arith.divf %33, %36 : vector<8x8x8xf32>
    "tpu.trace_start"() <{level = 10 : i32, message = "gqk,gkd->gqd"}> : () -> ()
    %cst_10 = arith.constant dense<0.000000e+00> : vector<8x8x8xf32>
    %38 = tpu.matmul %37, %19, %cst_10 {dimension_numbers = #tpu.dot_dimension_numbers<[2], [1], [1], [2], [0, 0, 0, 1, 1, 2], [0], [0]>} : vector<8x8x8xf32>, vector<8x8x8xf32>, vector<8x8x8xf32> -> vector<8x8x8xf32>
    "tpu.trace_stop"() : () -> ()
    %39 = vector.shape_cast %38 : vector<8x8x8xf32> to vector<2x4x8x8xf32>
    %40 = tpu.transpose %39, [0, 2, 1, 3] : vector<2x4x8x8xf32> -> vector<2x8x4x8xf32>
    %41 = vector.shape_cast %40 : vector<2x8x4x8xf32> to vector<16x32xf32>
    %c0_11 = arith.constant 0 : index
    %c0_12 = arith.constant 0 : index
    %42 = vector.load %arg4[%c0_11, %c0_12] : memref<32x32xf32, #tpu.memory_space<vmem>>, vector<32x32xf32>
    %cst_13 = arith.constant dense<0.000000e+00> : vector<16x32xf32>
    %43 = tpu.matmul %41, %42, %cst_13 {dimension_numbers = #tpu.dot_dimension_numbers<[1], [0], [0], [1], [0, 0, 1, 1], [], []>} : vector<16x32xf32>, vector<32x32xf32>, vector<16x32xf32> -> vector<16x32xf32>
    %c0_14 = arith.constant 0 : index
    %c0_15 = arith.constant 0 : index
    %44 = vector.load %arg5[%c0_14, %c0_15] : memref<1x32xf32, #tpu.memory_space<vmem>>, vector<1x32xf32>
    %45 = vector.broadcast %44 : vector<1x32xf32> to vector<16x32xf32>
    %46 = arith.addf %43, %45 : vector<16x32xf32>
    %c0_16 = arith.constant 0 : index
    %c0_17 = arith.constant 0 : index
    %47 = vector.load %arg6[%c0_16, %c0_17] : memref<16x32xf32, #tpu.memory_space<vmem>>, vector<16x32xf32>
    tpu.vector_store %arg6[%c0_16, %c0_17], %46 {strides = array<i32>} : memref<16x32xf32, #tpu.memory_space<vmem>>, vector<16x32xf32>,
    return
  }
  func.func @transform_0(%arg0: i32) -> (i32, i32) {
    %c0_i32 = arith.constant 0 : i32
    %c0_i32_0 = arith.constant 0 : i32
    return %arg0, %c0_i32 : i32, i32
  }
  func.func @transform_1(%arg0: i32) -> (i32, i32) {
    %c0_i32 = arith.constant 0 : i32
    %c0_i32_0 = arith.constant 0 : i32
    %c0_i32_1 = arith.constant 0 : i32
    return %c0_i32, %c0_i32_0 : i32, i32
  }
  func.func @transform_2(%arg0: i32) -> (i32, i32) {
    %c0_i32 = arith.constant 0 : i32
    %c0_i32_0 = arith.constant 0 : i32
    %c0_i32_1 = arith.constant 0 : i32
    return %c0_i32, %c0_i32_0 : i32, i32
  }
  func.func @transform_3(%arg0: i32) -> (i32, i32) {
    %c0_i32 = arith.constant 0 : i32
    %c0_i32_0 = arith.constant 0 : i32
    %c0_i32_1 = arith.constant 0 : i32
    return %c0_i32, %c0_i32_0 : i32, i32
  }
  func.func @transform_4(%arg0: i32) -> (i32, i32) {
    %c0_i32 = arith.constant 0 : i32
    %c0_i32_0 = arith.constant 0 : i32
    %c0_i32_1 = arith.constant 0 : i32
    return %c0_i32, %c0_i32_0 : i32, i32
  }
  func.func @transform_5(%arg0: i32) -> (i32, i32) {
    %c0_i32 = arith.constant 0 : i32
    %c0_i32_0 = arith.constant 0 : i32
    return %arg0, %c0_i32 : i32, i32
  }
}

</mosaic_0001>

<bundles_post_ra>
// kernel: causal_self_attention.1
= control target key start
LH: loop header
LB: loop body
LE: loop exit
PB: predicated region body
PF: predicated region fallthrough
CT: control target
= control target key end

     0   :  { %10 = vsyncpa [#allocation3], 0  ;;  %s3634_s0 = inlined_call_operand.hbm [shape: f32[16,32], index: 0, kind: input, shape index: {}]   ;;  %s3635_s1 = inlined_call_operand.hbm [shape: f32[32,96], index: 1, kind: input, shape index: {}]   ;;  %s3636_s2 = inlined_call_operand.vmem [shape: f32[1,96], index: 2, kind: input, shape index: {}]   ;;  %s3637_s3 = inlined_call_operand.hbm [shape: f32[32,32], index: 3, kind: input, shape index: {}]   ;;  %s3638_s4 = inlined_call_operand.vmem [shape: f32[1,32], index: 4, kind: input, shape index: {}]   ;;  %s3639_s5 = inlined_call_operand.hbm [shape: f32[16,32], index: 5, kind: output, shape index: {}]  }
   0x1   :  { %11 = vsyncpa [#allocation6], 0 }
   0x2   :  { %12 = vsyncpa [#allocation4], 0  ;;  %s3120_s18 = smov [#allocation5]   ;;  %s3121_s20 = smov [#allocation2]  }
   0x3   :  { %s30_s19 = sshll.u32 %s3120_s18, 4  ;;  %s18_s21 = sshll.u32 %s3121_s20, 4  ;;  %s31_s19 = int_to_ptr.vmem [resolvable:$true] %s30_s19  ;;  %s3167_s21 = int_to_ptr.vmem [resolvable:$true] %s18_s21 }
   0x4   :  { %s3026_s24 = scalar_lea.hbm %s3635_s1, 512 }
   0x5   :  { %p3027_p0 = scmp.ne.s32.totalorder %s3635_s1, %s3026_s24  ;;  %p3030_p1 = scmp.lt.u32.totalorder %s3026_s24, %s3635_s1 }
   0x7   :  { %p3032_p2 = pnand %p3030_p1, %p3027_p0 }
   0x9   :  { %3035 = shalt.err (!%p3032_p2)
}
   0xa   :  { %s3036_s29 = scalar_lea.vmem %s31_s19, 512  ;;  %p3041_p4 = scmp.lt.s32.totalorder %s31_s19, %s31_s19 }
   0xb   :  { %p3037_p3 = scmp.ne.s32.totalorder %s31_s19, %s3036_s29  ;;  %p3042_p5 = scmp.lt.s32.totalorder %s3036_s29, %s3036_s29 }
   0xd   :  { %p3043_p6 = por %p3042_p5, %p3041_p4 }
   0xf   :  { %p3044_p7 = pnand %p3043_p6, %p3037_p3 }
  0x11   :  { %3047 = shalt.err (!%p3044_p7)
}
  0x12   :  { %s3122_s30 = smov 128   ;;  %s3123_s6 = smov 8  }
  0x13   :  { %36 = dma.hbm_to_vmem [thread:$0]  %s3635_s1, 512, %s31_s19, [#allocation6], %s3122_s30, %s3122_s30, %s3123_s6  }
  0x14   :  { %s3048_s11 = scalar_lea.hbm %s3634_s0, 256 }
  0x15   :  { %p3049_p8 = scmp.ne.s32.totalorder %s3634_s0, %s3048_s11  ;;  %p3052_p9 = scmp.lt.u32.totalorder %s3048_s11, %s3634_s0 }
  0x17   :  { %p3054_p10 = pnand %p3052_p9, %p3049_p8 }
  0x19   :  { %3057 = shalt.err (!%p3054_p10)
}
  0x1a   :  { %s3058_s16 = scalar_lea.vmem %s3167_s21, 256  ;;  %p3063_p12 = scmp.lt.s32.totalorder %s3167_s21, %s3167_s21 }
  0x1b   :  { %p3059_p11 = scmp.ne.s32.totalorder %s3167_s21, %s3058_s16  ;;  %p3064_p13 = scmp.lt.s32.totalorder %s3058_s16, %s3058_s16 }
  0x1d   :  { %p3065_p0 = por %p3064_p13, %p3063_p12 }
  0x1f   :  { %p3066_p1 = pnand %p3065_p0, %p3059_p11 }
  0x21   :  { %3069 = shalt.err (!%p3066_p1)
}
  0x22   :  { %24 = dma.hbm_to_vmem [thread:$0]  %s3634_s0, 256, %s3167_s21, [#allocation3], %s3122_s30, %s3122_s30, %s3123_s6  }
  0x23   :  { %s3124_s18 = smov [#allocation7]   ;;  %s3070_s23 = scalar_lea.hbm %s3637_s3, 512 }
  0x24   :  { %s44_s19 = sshll.u32 %s3124_s18, 4  ;;  %p3071_p2 = scmp.ne.s32.totalorder %s3637_s3, %s3070_s23  ;;  %s45_s19 = int_to_ptr.vmem [resolvable:$true] %s44_s19 }
  0x25   :  { %p3074_p3 = scmp.lt.u32.totalorder %s3070_s23, %s3637_s3 }
  0x27   :  { %p3076_p4 = pnand %p3074_p3, %p3071_p2 }
  0x29   :  { %3079 = shalt.err (!%p3076_p4)
}
  0x2a   :  { %s3080_s28 = scalar_lea.vmem %s45_s19, 512  ;;  %p3085_p6 = scmp.lt.s32.totalorder %s45_s19, %s45_s19 }
  0x2b   :  { %p3081_p5 = scmp.ne.s32.totalorder %s45_s19, %s3080_s28  ;;  %p3086_p7 = scmp.lt.s32.totalorder %s3080_s28, %s3080_s28 }
  0x2d   :  { %p3087_p8 = por %p3086_p7, %p3085_p6 }
  0x2f   :  { %p3088_p9 = pnand %p3087_p8, %p3081_p5 }
  0x31   :  { %3091 = shalt.err (!%p3088_p9)
}
  0x32   :  { %50 = dma.hbm_to_vmem [thread:$0]  %s3637_s3, 512, %s45_s19, [#allocation6], %s3122_s30, %s3122_s30, %s3123_s6  }
  0x33   :  { %3114 = dma.done.wait [#allocation3], 256  }
  0x34   :  { %3115 = vsyncadd [#allocation3], 4294967040 }
  0x35   :  { %3116 = dma.done.wait [#allocation6], 1024  }
  0x36   :  { %3117 = vsyncadd [#allocation6], 4294966272  ;;  %vm75_vm0 = vcmask 261120   ;;  %v64_v0 = vld [vmem:[#allocation5] sm:$0xff]  ;;  %v65_v1 = vld [vmem:[#allocation5 + $0x8] sm:$0xff]  ;;  %s3125_s7 = smov 104   ;;  %v184_v25 = vlaneseq }
  0x37   :  { %v66_v2 = vld [vmem:[#allocation5 + $0x10] sm:$0xff]  ;;  %v2961_v3 = vpack.c.bf16 %v65_v1, %v64_v0  ;;  %v67_v4 = vld [vmem:[#allocation5 + $0x18] sm:$0xff]  ;;  %s3126_s8 = smov 120   ;;  %s3127_s9 = smov 112   ;;  %v3129_v18 = vmov 0.0   ;;  %vm3130_vm1 = vmmov 0  }
  0x38   :  { %v62_v5 = vld [vmem:[#allocation2] sm:$0xff]  ;;  %v2965_v6 = vpack.c.bf16 %v67_v4, %v66_v2  ;;  %v63_v7 = vld [vmem:[#allocation2 + $0x8] sm:$0xff]  ;;  %2870 = vmatprep.subr.mxu1 %v3129_v18  ;;  %2872 = vmatprep.mubr.msk.f32.mxu1 %vm3130_vm1, %v3129_v18  ;;  %s3131_s10 = smov 64   ;;  %v3132_v23 = vmov 1983009808   ;;  %v3275_v29 = vshrl.u32 %v184_v25, 7 }
  0x39   :  { %2867 = vmatprep.mubr.msk.f32.mxu0 %vm75_vm0, %v62_v5  ;;  %2962 = vmatprep.subr.bf16.mxu0 %v2961_v3  ;;  %v2769_v8 = vld [vmem:[%s3636_s2] ss:$0 sm:$0xff]  ;;  %s3128_s2 = smov 96   ;;  %v182_v24 = vunpack.c.l.s4 %v3132_v23  ;;  %v3133_v26 = vmov 1934713408   ;;  %vm1057_vm2 = vcmask 64512  }
  0x3a   :  { %2964 = vmatpush3.bf16.msra.mxu0 %v2961_v3  ;;  %v214_v27 = vunpack.c.l.s4 %v3133_v26  ;;  %s3134_s11 = smov 16   ;;  %s3135_s12 = smov 24   ;;  %vm2651_vm4 = vcmask 130048   ;;  %vm2654_vm5 = vcmask 195584  }
  0x3b   :  { %2966 = vmatprep.subr.bf16.mxu0 %v2965_v6  ;;  %v183_v28 = vunpack.c.0.s8 %v182_v24  ;;  %s3136_s15 = smov [#allocation8]  }
  0x3c   :  { %v215_v32 = vunpack.c.0.s8 %v214_v27  ;;  %s2756_s16 = sshll.u32 %s3136_s15, 4  ;;  %s2757_s16 = int_to_ptr.vmem [resolvable:$true] %s2756_s16 }
  0x3d   :  { %v3278_v33 = vsub.s32 %v183_v28, %v3275_v29  ;;  %s3092_s1 = scalar_lea.vmem %s2757_s16, 256  ;;  %p3097_p11 = scmp.lt.s32.totalorder %s2757_s16, %s2757_s16 }
  0x3e   :  { %2968 = vmatpush3.bf16.msra.mxu0 %v2965_v6  ;;  %v3281_v40 = vsub.s32 %v215_v32, %v3275_v29  ;;  %p3093_p10 = scmp.ne.s32.totalorder %s2757_s16, %s3092_s1  ;;  %p3098_p12 = scmp.lt.s32.totalorder %s3092_s1, %s3092_s1 }
  0x3f   :  { %2890 = vmatprep.subr.mxu0 %v3129_v18 }
  0x40   :  { %p3099_p13 = por %p3098_p12, %p3097_p11 }
  0x41   :  { %2868 = vmatmul.mubr.msk.f32.vlgmr.msra.gmra.mrb[0].mxu0 %vm75_vm0, %v63_v7 }
  0x42   :  { %2892 = vmatprep.mubr.msk.f32.mxu0 %vm3130_vm1, %v3129_v18  ;;  %p3100_p0 = pnand %p3099_p13, %p3093_p10 }
 0x114   :  { %v2869_v9 = vpop.f32.mrb[0].mxu0 }
 0x115   :  { %v148_v10 = vpop.f32.mrb[1].mxu0  ;;  %v3226_v12 = vadd.f32 %v2869_v9, %v2769_v8 }
 0x116   :  { %v149_v11 = vadd.f32 %v2769_v8, %v148_v10 }
 0x117   :  { %v3262_v21 = vmul.f32 0.35355338, %v3226_v12 }
 0x118   :  { %461 = vrot.lane.b32.xlu1 %v149_v11, %s3125_s7  ;;  %453 = vrot.lane.b32.xlu0 %v149_v11, %s3126_s8  ;;  %v3233_v13 = vmul.f32 0.35355338, %v149_v11 }
 0x11c   :  { %455 = vrot.lane.b32.xlu1 %v3226_v12, %s3126_s8  ;;  %457 = vrot.lane.b32.xlu0 %v149_v11, %s3127_s9 }
 0x120   :  { %463 = vrot.lane.b32.xlu1 %v3226_v12, %s3125_s7  ;;  %459 = vrot.lane.b32.xlu0 %v3226_v12, %s3127_s9 }
 0x124   :  { %465 = vrot.lane.b32.xlu0 %v149_v11, %s3128_s2 }
 0x128   :  { %161 = vrot.lane.b32.xlu0 %v3233_v13, %s3126_s8 }
 0x18a   :  { %v3237_v14 = vpop.permute.xlu0 %453  ;;  %v3240_v15 = vpop.permute.xlu1 %461 }
 0x18b   :  { %469 = vrot.lane.b32.xlu1 %v3237_v14, %s3128_s2 }
 0x18e   :  { %v3242_v16 = vpop.permute.xlu0 %457  ;;  %v3249_v17 = vpop.permute.xlu1 %455 }
 0x18f   :  { %477 = vrot.lane.b32.xlu1 %v3240_v15, %s3128_s2  ;;  %473 = vrot.lane.b32.xlu0 %v3242_v16, %s3128_s2 }
 0x192   :  { %v3255_v19 = vpop.permute.xlu1 %463  ;;  %v3257_v20 = vpop.permute.xlu0 %459 }
 0x193   :  { %167 = vrot.lane.b32.xlu1 %v3233_v13, %s3127_s9  ;;  %173 = vrot.lane.b32.xlu0 %v3233_v13, %s3125_s7 }
 0x196   :  { %v466_v22 = vpop.permute.xlu0 %465 }
 0x197   :  { %467 = vrot.lane.b32.xlu1 %v3226_v12, %s3128_s2  ;;  %471 = vrot.lane.b32.xlu0 %v3249_v17, %s3128_s2 }
 0x19a   :  { %v162_v30 = vpop.permute.xlu0 %161 }
 0x19b   :  { %475 = vrot.lane.b32.xlu1 %v3257_v20, %s3128_s2  ;;  %479 = vrot.lane.b32.xlu0 %v3255_v19, %s3128_s2 }
 0x19f   :  { %163 = vrot.lane.b32.xlu1 %v3262_v21, %s3126_s8  ;;  %169 = vrot.lane.b32.xlu0 %v3262_v21, %s3127_s9 }
 0x1a3   :  { %175 = vrot.lane.b32.xlu1 %v3262_v21, %s3125_s7 }
 0x1a7   :  { %761 = vrot.lane.b32.xlu1 %v149_v11, %s3131_s10 }
 0x1fd   :  { %v470_v31 = vpop.permute.xlu1 %469 }
 0x201   :  { %v478_v34 = vpop.permute.xlu1 %477  ;;  %v474_v35 = vpop.permute.xlu0 %473 }
 0x202   :  { %v505_v36 = vcombine.low %v470_v31, %v478_v34  ;;  %v506_v37 = vcombine.high %v470_v31, %v478_v34  ;;  %v489_v38 = vcombine.low %v466_v22, %v474_v35  ;;  %v490_v39 = vcombine.high %v466_v22, %v474_v35 }
 0x204   :  { %v513_v41 = vrot.slane %v505_v36, %v3278_v33  ;;  %v520_v42 = vrot.slane %v506_v37, %v3278_v33  ;;  %v497_v43 = vrot.slane %v489_v38, %v3278_v33  ;;  %v504_v44 = vrot.slane %v490_v39, %v3278_v33 }
 0x205   :  { %v168_v45 = vpop.permute.xlu1 %167  ;;  %v174_v46 = vpop.permute.xlu0 %173 }
 0x206   :  { %v521_v47 = vcombine.low %v497_v43, %v513_v41  ;;  %v522_v48 = vcombine.high %v497_v43, %v513_v41  ;;  %v537_v49 = vcombine.low %v504_v44, %v520_v42  ;;  %v538_v50 = vcombine.high %v504_v44, %v520_v42 }
 0x207   :  { %v179_v51 = vcombine.low %v3233_v13, %v168_v45  ;;  %v180_v52 = vcombine.high %v3233_v13, %v168_v45  ;;  %v195_v53 = vcombine.low %v162_v30, %v174_v46  ;;  %v196_v54 = vcombine.high %v162_v30, %v174_v46 }
 0x208   :  { %v529_v55 = vrot.slane %v521_v47, %v3281_v40  ;;  %v536_v56 = vrot.slane %v522_v48, %v3281_v40  ;;  %v545_v57 = vrot.slane %v537_v49, %v3281_v40  ;;  %v552_v58 = vrot.slane %v538_v50, %v3281_v40 }
 0x209   :  { %v187_v59 = vrot.slane %v179_v51, %v3278_v33  ;;  %v194_v60 = vrot.slane %v180_v52, %v3278_v33  ;;  %v203_v61 = vrot.slane %v195_v53, %v3278_v33  ;;  %v210_v62 = vrot.slane %v196_v54, %v3278_v33  ;;  %v468_v63 = vpop.permute.xlu1 %467  ;;  %v472_v0 = vpop.permute.xlu0 %471 }
 0x20a   :  { %v625_v1 = vcombine.low %v529_v55, %v536_v56  ;;  %v2776_v6 = vcombine.high %v529_v55, %v536_v56  ;;  %v641_v7 = vcombine.low %v545_v57, %v552_v58  ;;  %v2777_v26 = vcombine.high %v545_v57, %v552_v58 }
 0x20b   :  { %v211_v2 = vcombine.low %v187_v59, %v203_v61  ;;  %v212_v3 = vcombine.high %v187_v59, %v203_v61  ;;  %v227_v4 = vcombine.low %v194_v60, %v210_v62  ;;  %v228_v5 = vcombine.high %v194_v60, %v210_v62 }
 0x20c   :  { %v3302_v30 = vrot.slane %v625_v1, %v3278_v33  ;;  %v3309_v41 = vrot.slane %v2776_v6, %v3278_v33  ;;  %v3312_v42 = vrot.slane %v641_v7, %v3278_v33  ;;  %v656_v50 = vrot.slane %v2777_v26, %v3278_v33 }
 0x20d   :  { %v219_v8 = vrot.slane %v211_v2, %v3281_v40  ;;  %v226_v9 = vrot.slane %v212_v3, %v3281_v40  ;;  %v476_v10 = vpop.permute.xlu1 %475  ;;  %v480_v11 = vpop.permute.xlu0 %479  ;;  %v235_v27 = vrot.slane %v227_v4, %v3281_v40  ;;  %v242_v28 = vrot.slane %v228_v5, %v3281_v40 }
 0x20e   :  { %v557_v13 = vcombine.low %v468_v63, %v476_v10  ;;  %v558_v22 = vcombine.high %v468_v63, %v476_v10  ;;  %v573_v23 = vcombine.low %v472_v0, %v480_v11  ;;  %v574_v24 = vcombine.high %v472_v0, %v480_v11 }
 0x20f   :  { %v315_v36 = vcombine.low %v219_v8, %v226_v9  ;;  %v2772_v37 = vcombine.high %v219_v8, %v226_v9  ;;  %v331_v47 = vcombine.low %v235_v27, %v242_v28  ;;  %v2773_v48 = vcombine.high %v235_v27, %v242_v28 }
 0x210   :  { %v565_v31 = vrot.slane %v557_v13, %v3278_v33  ;;  %v572_v32 = vrot.slane %v558_v22, %v3278_v33  ;;  %v581_v34 = vrot.slane %v573_v23, %v3278_v33  ;;  %v588_v35 = vrot.slane %v574_v24, %v3278_v33 }
 0x211   :  { %v164_v38 = vpop.permute.xlu1 %163  ;;  %v170_v39 = vpop.permute.xlu0 %169  ;;  %v3321_v55 = vrot.slane %v315_v36, %v3278_v33  ;;  %v3324_v56 = vrot.slane %v2772_v37, %v3278_v33  ;;  %v657_v58 = vcombine.low %v3302_v30, %v3309_v41  ;;  %v338_v0 = vrot.slane %v331_v47, %v3278_v33 }
 0x212   :  { %v589_v43 = vcombine.low %v565_v31, %v581_v34  ;;  %v590_v44 = vcombine.high %v565_v31, %v581_v34  ;;  %v605_v45 = vcombine.low %v572_v32, %v588_v35  ;;  %v606_v46 = vcombine.high %v572_v32, %v588_v35 }
 0x213   :  { %v247_v49 = vcombine.low %v3262_v21, %v170_v39  ;;  %v248_v57 = vcombine.high %v3262_v21, %v170_v39  ;;  %v665_v1 = vrot.slane %v657_v58, %v3281_v40  ;;  %v673_v2 = vcombine.low %v3312_v42, %v656_v50 }
 0x214   :  { %v597_v51 = vrot.slane %v589_v43, %v3281_v40  ;;  %v604_v52 = vrot.slane %v590_v44, %v3281_v40  ;;  %v613_v53 = vrot.slane %v605_v45, %v3281_v40  ;;  %v620_v54 = vrot.slane %v606_v46, %v3281_v40 }
 0x215   :  { %v176_v59 = vpop.permute.xlu1 %175  ;;  %v346_v4 = vrot.slane %v2773_v48, %v3278_v33  ;;  %v255_v6 = vrot.slane %v247_v49, %v3278_v33  ;;  %v681_v7 = vrot.slane %v673_v2, %v3281_v40  ;;  %v347_v10 = vcombine.low %v3321_v55, %v3324_v56 }
 0x216   :  { %v693_v60 = vcombine.low %v597_v51, %v604_v52  ;;  %v2778_v61 = vcombine.high %v597_v51, %v604_v52  ;;  %v709_v62 = vcombine.low %v613_v53, %v620_v54  ;;  %v2779_v63 = vcombine.high %v613_v53, %v620_v54 }
 0x217   :  { %v263_v3 = vcombine.low %v164_v38, %v176_v59  ;;  %v264_v8 = vcombine.high %v164_v38, %v176_v59  ;;  %v348_v11 = vcombine.high %v3321_v55, %v3324_v56  ;;  %v262_v23 = vrot.slane %v248_v57, %v3278_v33 }
 0x218   :  { %v3334_v5 = vrot.slane %v693_v60, %v3278_v33  ;;  %v3337_v21 = vrot.slane %v2778_v61, %v3278_v33  ;;  %v716_v13 = vrot.slane %v709_v62, %v3278_v33  ;;  %v724_v22 = vrot.slane %v2779_v63, %v3278_v33 }
 0x219   :  { %v271_v9 = vrot.slane %v263_v3, %v3278_v33  ;;  %v658_v24 = vcombine.high %v3302_v30, %v3309_v41  ;;  %v689_v26 = vcombine.low %v665_v1, %v681_v7  ;;  %v278_v27 = vrot.slane %v264_v8, %v3278_v33 }
 0x21a   :  { %v674_v31 = vcombine.high %v3312_v42, %v656_v50  ;;  %v355_v34 = vrot.slane %v347_v10, %v3281_v40  ;;  %v363_v35 = vcombine.low %v338_v0, %v346_v4  ;;  %v725_v36 = vcombine.low %v3334_v5, %v3337_v21 }
 0x21b   :  { %v279_v28 = vcombine.low %v255_v6, %v271_v9  ;;  %v280_v32 = vcombine.high %v255_v6, %v271_v9  ;;  %2871 = vmatpush3.xpose.msk.msra.mxu1 %vm1057_vm2, %v689_v26  ;;  %v295_v38 = vcombine.low %v262_v23, %v278_v27  ;;  %v296_v39 = vcombine.high %v262_v23, %v278_v27 }
 0x21c   :  { %v364_v30 = vcombine.high %v338_v0, %v346_v4  ;;  %v741_v41 = vcombine.low %v716_v13, %v724_v22  ;;  %2875 = vmatprep.subr.mxu1 %v3129_v18  ;;  %v371_v42 = vrot.slane %v363_v35, %v3281_v40  ;;  %v726_v44 = vcombine.high %v3334_v5, %v3337_v21 }
 0x21d   :  { %v287_v37 = vrot.slane %v279_v28, %v3281_v40  ;;  %v294_v43 = vrot.slane %v280_v32, %v3281_v40  ;;  %v690_v45 = vcombine.high %v665_v1, %v681_v7  ;;  %v303_v46 = vrot.slane %v295_v38, %v3281_v40 }
 0x21e   :  { %v310_v47 = vrot.slane %v296_v39, %v3281_v40  ;;  %v379_v50 = vcombine.low %v355_v34, %v371_v42  ;;  %v672_v51 = vrot.slane %v658_v24, %v3281_v40  ;;  %v688_v54 = vrot.slane %v674_v31, %v3281_v40 }
 0x21f   :  { %v383_v48 = vcombine.low %v287_v37, %v294_v43  ;;  %v2774_v49 = vcombine.high %v287_v37, %v294_v43  ;;  %v733_v55 = vrot.slane %v725_v36, %v3281_v40  ;;  %v742_v56 = vcombine.high %v716_v13, %v724_v22 }
 0x220   :  { %v399_v52 = vcombine.low %v303_v46, %v310_v47  ;;  %v2775_v53 = vcombine.high %v303_v46, %v310_v47  ;;  %2873 = vmatmul.mubr.msk.f32.vlgmr.msra.gmra.mrb[0].mxu1 %vm1057_vm2, %v379_v50  ;;  %v749_v59 = vrot.slane %v741_v41, %v3281_v40  ;;  %v362_v62 = vrot.slane %v348_v11, %v3281_v40 }
 0x221   :  { %v390_v57 = vrot.slane %v383_v48, %v3278_v33  ;;  %v398_v58 = vrot.slane %v2774_v49, %v3278_v33  ;;  %2876 = vmatpush3.xpose.msk.msra.mxu1 %vm1057_vm2, %v690_v45  ;;  %2877 = vmatprep.mubr.msk.f32.mxu1 %vm3130_vm1, %v3129_v18  ;;  %v380_v0 = vcombine.high %v355_v34, %v371_v42  ;;  %v1669_v35 = vand.u32 127, %v184_v25 }
 0x222   :  { %v406_v60 = vrot.slane %v399_v52, %v3278_v33  ;;  %v414_v61 = vrot.slane %v2775_v53, %v3278_v33  ;;  %2880 = vmatprep.subr.mxu1 %v3129_v18  ;;  %v378_v1 = vrot.slane %v364_v30, %v3281_v40  ;;  %v757_v2 = vcombine.low %v733_v55, %v749_v59 }
 0x223   :  { %v415_v63 = vcombine.low %v390_v57, %v398_v58  ;;  %v691_v4 = vcombine.low %v672_v51, %v688_v54  ;;  %v416_v5 = vcombine.high %v390_v57, %v398_v58  ;;  %v740_v8 = vrot.slane %v726_v44, %v3281_v40 }
 0x224   :  { %v431_v3 = vcombine.low %v406_v60, %v414_v61  ;;  %v432_v21 = vcombine.high %v406_v60, %v414_v61  ;;  %2878 = vmatmul.mubr.msk.f32.vlgmr.msra.gmra.mrb[2].mxu1 %vm1057_vm2, %v380_v0  ;;  %2891 = vmatpush3.xpose.msk.msra.mxu0 %vm1057_vm2, %v757_v2  ;;  %v756_v9 = vrot.slane %v742_v56, %v3281_v40 }
 0x225   :  { %v423_v6 = vrot.slane %v415_v63, %v3281_v40  ;;  %2881 = vmatpush3.xpose.msk.msra.mxu1 %vm1057_vm2, %v691_v4  ;;  %2882 = vmatprep.mubr.msk.f32.mxu1 %vm3130_vm1, %v3129_v18  ;;  %v381_v10 = vcombine.low %v362_v62, %v378_v1  ;;  %v692_v11 = vcombine.high %v672_v51, %v688_v54 }
 0x226   :  { %v439_v7 = vrot.slane %v431_v3, %v3281_v40  ;;  %2885 = vmatprep.subr.mxu1 %v3129_v18  ;;  %2900 = vmatprep.subr.mxu0 %v3129_v18  ;;  %v430_v22 = vrot.slane %v416_v5, %v3281_v40  ;;  %v446_v23 = vrot.slane %v432_v21, %v3281_v40  ;;  %v762_v21 = vpop.permute.xlu1 %761 }
 0x227   :  { %v759_v24 = vcombine.low %v740_v8, %v756_v9  ;;  %v382_v26 = vcombine.high %v362_v62, %v378_v1  ;;  %v758_v27 = vcombine.high %v733_v55, %v749_v59  ;;  %v760_v32 = vcombine.high %v740_v8, %v756_v9 }
 0x228   :  { %v447_v13 = vcombine.low %v423_v6, %v439_v7  ;;  %2883 = vmatmul.mubr.msk.f32.vlgmr.msra.gmra.mrb[4].mxu1 %vm1057_vm2, %v381_v10  ;;  %v448_v28 = vcombine.high %v423_v6, %v439_v7  ;;  %v449_v31 = vcombine.low %v430_v22, %v446_v23  ;;  %v450_v34 = vcombine.high %v430_v22, %v446_v23 }
 0x229   :  { %2886 = vmatpush3.xpose.msk.msra.mxu1 %vm1057_vm2, %v692_v11  ;;  %2887 = vmatprep.mubr.msk.f32.mxu1 %vm3130_vm1, %v3129_v18  ;;  %vm3421_vm3 = vcmp.ge.s32.totalorder %v3275_v29, %v1669_v35 }
 0x22a   :  { %2895 = vmatprep.subr.mxu1 %v3129_v18  ;;  %2893 = vmatmul.mubr.msk.f32.vlgmr.msra.gmra.mrb[2].mxu0 %vm1057_vm2, %v447_v13 }
 0x22b   :  { %2901 = vmatpush3.xpose.msk.msra.mxu0 %vm1057_vm2, %v759_v24  ;;  %2902 = vmatprep.mubr.msk.f32.mxu0 %vm3130_vm1, %v3129_v18 }
 0x22c   :  { %2888 = vmatmul.mubr.msk.f32.vlgmr.msra.gmra.mrb[6].mxu1 %vm1057_vm2, %v382_v26  ;;  %2910 = vmatprep.subr.mxu0 %v3129_v18 }
 0x22d   :  { %2896 = vmatpush3.xpose.msk.msra.mxu1 %vm1057_vm2, %v758_v27  ;;  %2897 = vmatprep.mubr.msk.f32.mxu1 %vm3130_vm1, %v3129_v18 }
 0x22e   :  { %2905 = vmatprep.subr.mxu1 %v3129_v18  ;;  %2903 = vmatmul.mubr.msk.f32.vlgmr.msra.gmra.mrb[4].mxu0 %vm1057_vm2, %v449_v31 }
 0x22f   :  { %2912 = vmatprep.mubr.msk.f32.mxu0 %vm3130_vm1, %v3129_v18 }
 0x230   :  { %2898 = vmatmul.mubr.msk.f32.vlgmr.msra.gmra.mrb[8].mxu1 %vm1057_vm2, %v448_v28 }
 0x231   :  { %2906 = vmatpush3.xpose.msk.msra.mxu1 %vm1057_vm2, %v760_v32  ;;  %2907 = vmatprep.mubr.msk.f32.mxu1 %vm3130_vm1, %v3129_v18 }
 0x232   :  { %2915 = vmatprep.subr.mxu1 %v3129_v18 }
 0x234   :  { %2908 = vmatmul.mubr.msk.f32.vlgmr.msra.gmra.mrb[10].mxu1 %vm1057_vm2, %v450_v34 }
 0x235   :  { %2917 = vmatprep.mubr.msk.f32.mxu1 %vm3130_vm1, %v3129_v18 }
 0x2f3   :  { %v1130_v37 = vpop.f32.mrb[0].mxu1 }
 0x2f4   :  { %v1673_v38 = vsel %vm3421_vm3, %v1130_v37, -1e+30  ;;  %v2874_v39 = vpop.f32.mrb[1].mxu1 }
 0x2f5   :  { %v1681_v30 = vsel %vm1057_vm2, %v1673_v38, -inf }
 0x2f6   :  { %1682 = vmax.xlane.f32.xlu0 %v1681_v30 }
 0x2f7   :  { %v1206_v41 = vpop.f32.mrb[2].mxu1 }
 0x2f8   :  { %v2879_v43 = vpop.f32.mrb[3].mxu1  ;;  %v1674_v58 = vsel %vm3421_vm3, %v1206_v41, -1e+30 }
 0x2f9   :  { %v1684_v63 = vsel %vm1057_vm2, %v1674_v58, -inf }
 0x2fb   :  { %v1282_v42 = vpop.f32.mrb[4].mxu1 }
 0x2fc   :  { %v1675_v44 = vsel %vm3421_vm3, %v1282_v42, -1e+30  ;;  %v2884_v25 = vpop.f32.mrb[5].mxu1 }
 0x2fd   :  { %v1687_v29 = vsel %vm1057_vm2, %v1675_v44, -inf  ;;  %v1434_v45 = vpop.f32.mrb[2].mxu0 }
 0x2fe   :  { %1688 = vmax.xlane.f32.xlu0 %v1687_v29  ;;  %v1677_v46 = vsel %vm3421_vm3, %v1434_v45, -1e+30  ;;  %v2894_v47 = vpop.f32.mrb[3].mxu0 }
 0x2ff   :  { %v1358_v48 = vpop.f32.mrb[6].mxu1  ;;  %v1693_v49 = vsel %vm1057_vm2, %v1677_v46, -inf }
 0x300   :  { %v1676_v50 = vsel %vm3421_vm3, %v1358_v48, -1e+30  ;;  %v2889_v51 = vpop.f32.mrb[7].mxu1  ;;  %1694 = vmax.xlane.f32.xlu1 %v1693_v49 }
 0x301   :  { %v1690_v52 = vsel %vm1057_vm2, %v1676_v50, -inf  ;;  %v1586_v53 = vpop.f32.mrb[4].mxu0 }
 0x302   :  { %1691 = vmax.xlane.f32.xlu0 %v1690_v52  ;;  %v1679_v54 = vsel %vm3421_vm3, %v1586_v53, -1e+30  ;;  %v2904_v55 = vpop.f32.mrb[5].mxu0 }
 0x303   :  { %v1510_v56 = vpop.f32.mrb[8].mxu1  ;;  %v1699_v57 = vsel %vm1057_vm2, %v1679_v54, -inf }
 0x304   :  { %v1678_v59 = vsel %vm3421_vm3, %v1510_v56, -1e+30  ;;  %v2899_v60 = vpop.f32.mrb[9].mxu1  ;;  %1700 = vmax.xlane.f32.xlu1 %v1699_v57 }
 0x305   :  { %v1696_v61 = vsel %vm1057_vm2, %v1678_v59, -inf }
 0x306   :  { %1697 = vmax.xlane.f32.xlu0 %v1696_v61 }
 0x307   :  { %v1662_v62 = vpop.f32.mrb[10].mxu1 }
 0x308   :  { %v1680_v0 = vsel %vm3421_vm3, %v1662_v62, -1e+30  ;;  %v2909_v1 = vpop.f32.mrb[11].mxu1  ;;  %1685 = vmax.xlane.f32.xlu1 %v1684_v63 }
 0x309   :  { %v1702_v2 = vsel %vm1057_vm2, %v1680_v0, -inf }
 0x30a   :  { %1703 = vmax.xlane.f32.xlu0 %v1702_v2 }
 0x319   :  { %769 = vrot.lane.b32.xlu1 %v3242_v16, %s3131_s10 }
 0x31d   :  { %773 = vrot.lane.b32.xlu1 %v3240_v15, %s3131_s10 }
 0x320   :  { %765 = vrot.lane.b32.xlu0 %v3237_v14, %s3131_s10 }
 0x321   :  { %763 = vrot.lane.b32.xlu1 %v3226_v12, %s3131_s10 }
 0x383   :  { %v1683_v3 = vpop.xlane.xlu0 %1682 }
 0x384   :  { %v1705_v4 = vsub.f32 %v1673_v38, %v1683_v3 }
 0x386   :  { %v1713_v5 = vmul.f32 1.442695, %v1705_v4 }
 0x388   :  { %2994 = vpow2.f32 %v1713_v5 }
 0x38b   :  { %v1689_v6 = vpop.xlane.xlu0 %1688 }
 0x38c   :  { %v1707_v7 = vsub.f32 %v1675_v44, %v1689_v6 }
 0x38d   :  { %v1695_v8 = vpop.xlane.xlu1 %1694 }
 0x38e   :  { %v1717_v9 = vmul.f32 1.442695, %v1707_v7  ;;  %v1709_v10 = vsub.f32 %v1677_v46, %v1695_v8 }
 0x38f   :  { %v1692_v16 = vpop.xlane.xlu0 %1691 }
 0x390   :  { %2996 = vpow2.f32 %v1717_v9  ;;  %v1721_v11 = vmul.f32 1.442695, %v1709_v10  ;;  %v1708_v23 = vsub.f32 %v1676_v50, %v1692_v16 }
 0x391   :  { %v1701_v15 = vpop.xlane.xlu1 %1700 }
 0x392   :  { %v3457_v13 = vpop.eup %2994  ;;  %2998 = vpow2.f32 %v1721_v11  ;;  %v1711_v14 = vsub.f32 %v1679_v54, %v1701_v15  ;;  %v1719_v34 = vmul.f32 1.442695, %v1708_v23 }
 0x393   :  { %v1698_v22 = vpop.xlane.xlu0 %1697  ;;  %v1729_v12 = vsel %vm1057_vm2, %v3457_v13, 0.0 }
 0x394   :  { %v1710_v24 = vsub.f32 %v1678_v59, %v1698_v22  ;;  %1730 = vadd.xlane.f32.xlu1 %v1729_v12  ;;  %v1725_v26 = vmul.f32 1.442695, %v1711_v14 }
 0x395   :  { %v1686_v27 = vpop.xlane.xlu1 %1685 }
 0x396   :  { %v1723_v28 = vmul.f32 1.442695, %v1710_v24  ;;  %3000 = vpow2.f32 %v1725_v26  ;;  %v1706_v31 = vsub.f32 %v1674_v58, %v1686_v27 }
 0x397   :  { %v1704_v32 = vpop.xlane.xlu0 %1703 }
 0x398   :  { %3002 = vpow2.f32 %v1723_v28  ;;  %v1712_v35 = vsub.f32 %v1680_v0, %v1704_v32  ;;  %v1715_v36 = vmul.f32 1.442695, %v1706_v31 }
 0x399   :  { %v770_v37 = vpop.permute.xlu1 %769 }
 0x39a   :  { %v3461_v38 = vpop.eup %2996  ;;  %3004 = vpow2.f32 %v1715_v36  ;;  %v1727_v39 = vmul.f32 1.442695, %v1712_v35  ;;  %v785_v43 = vcombine.low %v762_v21, %v770_v37  ;;  %v786_v42 = vcombine.high %v762_v21, %v770_v37 }
 0x39b   :  { %v1735_v30 = vsel %vm1057_vm2, %v3461_v38, 0.0  ;;  %3006 = vpow2.f32 %v1719_v34  ;;  %v766_v44 = vpop.permute.xlu0 %765 }
 0x39c   :  { %v3465_v41 = vpop.eup %2998  ;;  %1736 = vadd.xlane.f32.xlu1 %v1735_v30  ;;  %3008 = vpow2.f32 %v1727_v39  ;;  %v793_v48 = vrot.slane %v785_v43, %v3278_v33  ;;  %v800_v49 = vrot.slane %v786_v42, %v3278_v33 }
 0x39d   :  { %v774_v25 = vpop.permute.xlu1 %773  ;;  %v1741_v29 = vsel %vm1057_vm2, %v3465_v41, 0.0 }
 0x39e   :  { %v801_v45 = vcombine.low %v766_v44, %v774_v25  ;;  %v802_v46 = vcombine.high %v766_v44, %v774_v25  ;;  %1742 = vadd.xlane.f32.xlu0 %v1741_v29 }
 0x3a0   :  { %v3469_v47 = vpop.eup %3000  ;;  %v809_v50 = vrot.slane %v801_v45, %v3278_v33  ;;  %v816_v51 = vrot.slane %v802_v46, %v3278_v33 }
 0x3a1   :  { %v1747_v52 = vsel %vm1057_vm2, %v3469_v47, 0.0  ;;  %v764_v34 = vpop.permute.xlu1 %763 }
 0x3a2   :  { %v3477_v53 = vpop.eup %3002  ;;  %v817_v54 = vcombine.low %v793_v48, %v809_v50  ;;  %v818_v55 = vcombine.high %v793_v48, %v809_v50  ;;  %v833_v56 = vcombine.low %v800_v49, %v816_v51  ;;  %v834_v57 = vcombine.high %v800_v49, %v816_v51  ;;  %1748 = vadd.xlane.f32.xlu0 %v1747_v52 }
 0x3a3   :  { %v1744_v58 = vsel %vm1057_vm2, %v3477_v53, 0.0 }
 0x3a4   :  { %v3481_v59 = vpop.eup %3004  ;;  %v825_v60 = vrot.slane %v817_v54, %v3281_v40  ;;  %v832_v61 = vrot.slane %v818_v55, %v3281_v40  ;;  %v841_v62 = vrot.slane %v833_v56, %v3281_v40  ;;  %v848_v63 = vrot.slane %v834_v57, %v3281_v40  ;;  %1745 = vadd.xlane.f32.xlu1 %v1744_v58 }
 0x3a5   :  { %v1732_v0 = vsel %vm1057_vm2, %v3481_v59, 0.0  ;;  %v3489_v1 = vpop.eup %3006 }
 0x3a6   :  { %v921_v2 = vcombine.low %v825_v60, %v832_v61  ;;  %v2780_v3 = vcombine.high %v825_v60, %v832_v61  ;;  %v937_v4 = vcombine.low %v841_v62, %v848_v63  ;;  %v2781_v5 = vcombine.high %v841_v62, %v848_v63  ;;  %1733 = vadd.xlane.f32.xlu0 %v1732_v0  ;;  %v3495_v9 = vpop.eup %3008 }
 0x3a7   :  { %v1738_v10 = vsel %vm1057_vm2, %v3489_v1, 0.0  ;;  %v1750_v26 = vsel %vm1057_vm2, %v3495_v9, 0.0 }
 0x3a8   :  { %v928_v21 = vrot.slane %v921_v2, %v3278_v33  ;;  %v936_v6 = vrot.slane %v2780_v3, %v3278_v33  ;;  %v944_v7 = vrot.slane %v937_v4, %v3278_v33  ;;  %v952_v8 = vrot.slane %v2781_v5, %v3278_v33 }
 0x3aa   :  { %1739 = vadd.xlane.f32.xlu0 %v1738_v10  ;;  %v953_v16 = vcombine.low %v928_v21, %v936_v6  ;;  %v969_v11 = vcombine.low %v944_v7, %v952_v8  ;;  %v954_v15 = vcombine.high %v928_v21, %v936_v6  ;;  %v970_v14 = vcombine.high %v944_v7, %v952_v8 }
 0x3ac   :  { %v961_v22 = vrot.slane %v953_v16, %v3281_v40  ;;  %v977_v12 = vrot.slane %v969_v11, %v3281_v40  ;;  %v968_v23 = vrot.slane %v954_v15, %v3281_v40  ;;  %v984_v24 = vrot.slane %v970_v14, %v3281_v40 }
 0x3ae   :  { %1751 = vadd.xlane.f32.xlu0 %v1750_v26  ;;  %v985_v27 = vcombine.low %v961_v22, %v977_v12  ;;  %v986_v28 = vcombine.high %v961_v22, %v977_v12  ;;  %v987_v31 = vcombine.low %v968_v23, %v984_v24  ;;  %v988_v32 = vcombine.high %v968_v23, %v984_v24 }
 0x3b0   :  { %2911 = vmatpush3.msra.mxu0 %v985_v27  ;;  %2916 = vmatpush3.msra.mxu1 %v986_v28 }
 0x3b1   :  { %2920 = vmatprep.subr.mxu0 %v3129_v18  ;;  %2925 = vmatprep.subr.mxu1 %v3129_v18 }
 0x3b5   :  { %771 = vrot.lane.b32.xlu1 %v3257_v20, %s3131_s10 }
 0x3b9   :  { %775 = vrot.lane.b32.xlu1 %v3255_v19, %s3131_s10 }
 0x3c4   :  { %767 = vrot.lane.b32.xlu0 %v3249_v17, %s3131_s10 }
 0x421   :  { %v1731_v35 = vpop.xlane.xlu1 %1730 }
 0x422   :  { %3010 = vrcp.f32 %v1731_v35 }
 0x429   :  { %v1737_v36 = vpop.xlane.xlu1 %1736 }
 0x42a   :  { %3012 = vrcp.f32 %v1737_v36 }
 0x42b   :  { %v1743_v37 = vpop.xlane.xlu0 %1742 }
 0x42c   :  { %v3011_v39 = vpop.eup %3010 }
 0x42d   :  { %v1754_v30 = vmul.f32 %v3011_v39, %v3457_v13 }
 0x42f   :  { %2913 = vmatmul.mubr.msk.f32.vlgmr.msra.gmra.mrb[6].mxu0 %vm1057_vm2, %v1754_v30  ;;  %v1749_v43 = vpop.xlane.xlu0 %1748 }
 0x430   :  { %2921 = vmatpush3.msra.mxu0 %v987_v31  ;;  %2922 = vmatprep.mubr.msk.f32.mxu0 %vm3130_vm1, %v3129_v18 }
 0x431   :  { %2930 = vmatprep.subr.mxu0 %v3129_v18  ;;  %v1746_v19 = vpop.xlane.xlu1 %1745 }
 0x433   :  { %v1734_v17 = vpop.xlane.xlu0 %1733 }
 0x434   :  { %v3013_v20 = vpop.eup %3012  ;;  %3014 = vrcp.f32 %v1734_v17 }
 0x435   :  { %v1758_v42 = vmul.f32 %v3013_v20, %v3461_v38  ;;  %v772_v13 = vpop.permute.xlu1 %771 }
 0x436   :  { %v853_v29 = vcombine.low %v764_v34, %v772_v13  ;;  %v854_v46 = vcombine.high %v764_v34, %v772_v13 }
 0x437   :  { %2923 = vmatmul.mubr.msk.f32.vlgmr.msra.gmra.mrb[8].mxu0 %vm1057_vm2, %v1758_v42  ;;  %v1740_v44 = vpop.xlane.xlu0 %1739 }
 0x438   :  { %3016 = vrcp.f32 %v1740_v44  ;;  %2932 = vmatprep.mubr.msk.f32.mxu0 %vm3130_vm1, %v3129_v18  ;;  %v861_v38 = vrot.slane %v853_v29, %v3278_v33  ;;  %v868_v55 = vrot.slane %v854_v46, %v3278_v33 }
 0x439   :  { %v776_v48 = vpop.permute.xlu1 %775  ;;  %3018 = vrcp.f32 %v1743_v37 }
 0x43a   :  { %3020 = vrcp.f32 %v1746_v19 }
 0x43b   :  { %v1752_v25 = vpop.xlane.xlu0 %1751  ;;  %3022 = vrcp.f32 %v1749_v43 }
 0x43c   :  { %3024 = vrcp.f32 %v1752_v25 }
 0x43e   :  { %v3015_v45 = vpop.eup %3014 }
 0x43f   :  { %v1756_v49 = vmul.f32 %v3015_v45, %v3481_v59  ;;  %v768_v50 = vpop.permute.xlu0 %767 }
 0x440   :  { %v869_v51 = vcombine.low %v768_v50, %v776_v48  ;;  %v870_v52 = vcombine.high %v768_v50, %v776_v48 }
 0x441   :  { %2918 = vmatmul.mubr.msk.f32.vlgmr.msra.gmra.mrb[12].mxu1 %vm1057_vm2, %v1756_v49 }
 0x442   :  { %v3017_v54 = vpop.eup %3016  ;;  %v877_v56 = vrot.slane %v869_v51, %v3278_v33  ;;  %v884_v57 = vrot.slane %v870_v52, %v3278_v33  ;;  %2926 = vmatpush3.msra.mxu1 %v988_v32  ;;  %2927 = vmatprep.mubr.msk.f32.mxu1 %vm3130_vm1, %v3129_v18 }
 0x443   :  { %v1760_v58 = vmul.f32 %v3017_v54, %v3489_v1  ;;  %2935 = vmatprep.subr.mxu1 %v3129_v18  ;;  %v3019_v16 = vpop.eup %3018 }
 0x444   :  { %v885_v59 = vcombine.low %v861_v38, %v877_v56  ;;  %v886_v60 = vcombine.high %v861_v38, %v877_v56  ;;  %v901_v61 = vcombine.low %v868_v55, %v884_v57  ;;  %v902_v62 = vcombine.high %v868_v55, %v884_v57  ;;  %v3021_v12 = vpop.eup %3020 }
 0x445   :  { %2928 = vmatmul.mubr.msk.f32.vlgmr.msra.gmra.mrb[14].mxu1 %vm1057_vm2, %v1760_v58  ;;  %v3023_v26 = vpop.eup %3022  ;;  %v1764_v35 = vmul.f32 %v3021_v12, %v3477_v53  ;;  %v1762_v36 = vmul.f32 %v3019_v16, %v3465_v41 }
 0x446   :  { %v893_v63 = vrot.slane %v885_v59, %v3281_v40  ;;  %v900_v0 = vrot.slane %v886_v60, %v3281_v40  ;;  %v909_v2 = vrot.slane %v901_v61, %v3281_v40  ;;  %v916_v3 = vrot.slane %v902_v62, %v3281_v40  ;;  %2937 = vmatprep.mubr.msk.f32.mxu1 %vm3130_vm1, %v3129_v18  ;;  %v3025_v34 = vpop.eup %3024 }
 0x447   :  { %v1766_v30 = vmul.f32 %v3023_v26, %v3469_v47  ;;  %v1768_v43 = vmul.f32 %v3025_v34, %v3495_v9 }
 0x448   :  { %v989_v1 = vcombine.low %v893_v63, %v900_v0  ;;  %v2782_v4 = vcombine.high %v893_v63, %v900_v0  ;;  %v1005_v5 = vcombine.low %v909_v2, %v916_v3  ;;  %v2783_v21 = vcombine.high %v909_v2, %v916_v3 }
 0x44a   :  { %v996_v6 = vrot.slane %v989_v1, %v3278_v33  ;;  %v1004_v7 = vrot.slane %v2782_v4, %v3278_v33  ;;  %v1012_v8 = vrot.slane %v1005_v5, %v3278_v33  ;;  %v1020_v10 = vrot.slane %v2783_v21, %v3278_v33 }
 0x44c   :  { %v1021_v11 = vcombine.low %v996_v6, %v1004_v7  ;;  %v1037_v15 = vcombine.low %v1012_v8, %v1020_v10  ;;  %v1022_v14 = vcombine.high %v996_v6, %v1004_v7  ;;  %v1038_v22 = vcombine.high %v1012_v8, %v1020_v10 }
 0x44e   :  { %v1029_v23 = vrot.slane %v1021_v11, %v3281_v40  ;;  %v1045_v24 = vrot.slane %v1037_v15, %v3281_v40  ;;  %v1036_v27 = vrot.slane %v1022_v14, %v3281_v40  ;;  %v1052_v28 = vrot.slane %v1038_v22, %v3281_v40 }
 0x450   :  { %v1053_v31 = vcombine.low %v1029_v23, %v1045_v24  ;;  %v1054_v32 = vcombine.high %v1029_v23, %v1045_v24  ;;  %v1055_v37 = vcombine.low %v1036_v27, %v1052_v28  ;;  %v1056_v39 = vcombine.high %v1036_v27, %v1052_v28 }
 0x452   :  { %2931 = vmatpush3.msra.mxu0 %v1053_v31  ;;  %2936 = vmatpush3.msra.mxu1 %v1054_v32 }
 0x453   :  { %2933 = vmatmul.mubr.msk.f32.vlgmr.msra.gmra.mrb[10].mxu0 %vm1057_vm2, %v1762_v36  ;;  %2938 = vmatmul.mubr.msk.f32.vlgmr.msra.gmra.mrb[16].mxu1 %vm1057_vm2, %v1764_v35 }
 0x454   :  { %2940 = vmatprep.subr.mxu0 %v3129_v18  ;;  %2945 = vmatprep.subr.mxu1 %v3129_v18 }
 0x455   :  { %2941 = vmatpush3.msra.mxu0 %v1055_v37  ;;  %2946 = vmatpush3.msra.mxu1 %v1056_v39 }
 0x456   :  { %2942 = vmatprep.mubr.msk.f32.mxu0 %vm3130_vm1, %v3129_v18  ;;  %2947 = vmatprep.mubr.msk.f32.mxu1 %vm3130_vm1, %v3129_v18 }
 0x457   :  { %2943 = vmatmul.mubr.msk.f32.vlgmr.msra.gmra.mrb[12].mxu0 %vm1057_vm2, %v1766_v30  ;;  %2948 = vmatmul.mubr.msk.f32.vlgmr.msra.gmra.mrb[18].mxu1 %vm1057_vm2, %v1768_v43 }
 0x502   :  { %v1838_v41 = vpop.f32.mrb[6].mxu0 }
 0x503   :  { %v2914_v53 = vpop.f32.mrb[7].mxu0 }
 0x50a   :  { %v1984_v19 = vpop.f32.mrb[8].mxu0 }
 0x50b   :  { %v2353_v17 = vcombine.low %v1838_v41, %v1984_v19  ;;  %v2354_v20 = vcombine.high %v1838_v41, %v1984_v19  ;;  %v2924_v47 = vpop.f32.mrb[9].mxu0  ;;  %v2657_v19 = vld [vmem:[#allocation7] sm:$0xff] }
 0x50d   :  { %v2361_v45 = vrot.slane %v2353_v17, %v3278_v33  ;;  %v2368_v18 = vrot.slane %v2354_v20, %v3278_v33  ;;  %v2658_v17 = vld [vmem:[#allocation7 + $0x8] sm:$0xff] }
 0x514   :  { %v1911_v42 = vpop.f32.mrb[12].mxu1 }
 0x515   :  { %v2919_v9 = vpop.f32.mrb[13].mxu1 }
 0x518   :  { %v2057_v44 = vpop.f32.mrb[14].mxu1 }
 0x519   :  { %v2369_v13 = vcombine.low %v1911_v42, %v2057_v44  ;;  %v2370_v25 = vcombine.high %v1911_v42, %v2057_v44  ;;  %v2929_v29 = vpop.f32.mrb[15].mxu1  ;;  %v2969_v44 = vpack.c.bf16 %v2658_v17, %v2657_v19 }
 0x51b   :  { %v2377_v46 = vrot.slane %v2369_v13, %v3278_v33  ;;  %v2384_v48 = vrot.slane %v2370_v25, %v3278_v33  ;;  %2970 = vmatprep.subr.bf16.mxu0 %v2969_v44 }
 0x51c   :  { %2972 = vmatpush3.bf16.msra.mxu0 %v2969_v44 }
 0x51d   :  { %v2385_v49 = vcombine.low %v2361_v45, %v2377_v46  ;;  %v2386_v50 = vcombine.high %v2361_v45, %v2377_v46  ;;  %v2401_v51 = vcombine.low %v2368_v18, %v2384_v48  ;;  %v2402_v52 = vcombine.high %v2368_v18, %v2384_v48  ;;  %v2659_v18 = vld [vmem:[#allocation7 + $0x10] sm:$0xff]  ;;  %v2660_v46 = vld [vmem:[#allocation7 + $0x18] sm:$0xff] }
 0x51f   :  { %v2393_v38 = vrot.slane %v2385_v49, %v3281_v40  ;;  %v2400_v54 = vrot.slane %v2386_v50, %v3281_v40  ;;  %v2409_v55 = vrot.slane %v2401_v51, %v3281_v40  ;;  %v2416_v56 = vrot.slane %v2402_v52, %v3281_v40 }
 0x520   :  { %v2973_v52 = vpack.c.bf16 %v2660_v46, %v2659_v18 }
 0x521   :  { %v2489_v57 = vcombine.low %v2393_v38, %v2400_v54  ;;  %v2808_v58 = vcombine.high %v2393_v38, %v2400_v54  ;;  %v2505_v59 = vcombine.low %v2409_v55, %v2416_v56  ;;  %v2809_v60 = vcombine.high %v2409_v55, %v2416_v56 }
 0x522   :  { %2974 = vmatprep.subr.bf16.mxu0 %v2973_v52 }
 0x523   :  { %v2496_v61 = vrot.slane %v2489_v57, %v3278_v33  ;;  %v2504_v62 = vrot.slane %v2808_v58, %v3278_v33  ;;  %v2512_v63 = vrot.slane %v2505_v59, %v3278_v33  ;;  %v2520_v0 = vrot.slane %v2809_v60, %v3278_v33  ;;  %2976 = vmatpush3.bf16.msra.mxu0 %v2973_v52 }
 0x525   :  { %v2521_v2 = vcombine.low %v2496_v61, %v2504_v62  ;;  %v2537_v3 = vcombine.low %v2512_v63, %v2520_v0  ;;  %v2522_v1 = vcombine.high %v2496_v61, %v2504_v62  ;;  %v2538_v4 = vcombine.high %v2512_v63, %v2520_v0 }
 0x526   :  { %v2130_v5 = vpop.f32.mrb[10].mxu0  ;;  %v2203_v21 = vpop.f32.mrb[16].mxu1 }
 0x527   :  { %v2934_v6 = vpop.f32.mrb[11].mxu0  ;;  %v2939_v7 = vpop.f32.mrb[17].mxu1  ;;  %v3574_v8 = vrot.slane %v2521_v2, %v3281_v40  ;;  %v3577_v10 = vrot.slane %v2537_v3, %v3281_v40  ;;  %v2536_v16 = vrot.slane %v2522_v1, %v3281_v40  ;;  %v2552_v11 = vrot.slane %v2538_v4, %v3281_v40 }
 0x529   :  { %v2554_v15 = vcombine.high %v3574_v8, %v3577_v10  ;;  %v2553_v14 = vcombine.low %v3574_v8, %v3577_v10  ;;  %v2555_v22 = vcombine.low %v2536_v16, %v2552_v11  ;;  %v2556_v12 = vcombine.high %v2536_v16, %v2552_v11  ;;  %v2812_v8 = vld [vmem:[%s3638_s4] ss:$0 sm:$0xff] }
 0x52a   :  { %v2276_v23 = vpop.f32.mrb[12].mxu0  ;;  %v2349_v24 = vpop.f32.mrb[18].mxu1 }
 0x52b   :  { %v2421_v26 = vcombine.low %v2130_v5, %v2276_v23  ;;  %v2422_v27 = vcombine.high %v2130_v5, %v2276_v23  ;;  %v2437_v28 = vcombine.low %v2203_v21, %v2349_v24  ;;  %v2438_v31 = vcombine.high %v2203_v21, %v2349_v24  ;;  %2627 = vrot.lane.b32.xlu0 %v2554_v15, %s3123_s6  ;;  %v2944_v32 = vpop.f32.mrb[13].mxu0  ;;  %v2949_v34 = vpop.f32.mrb[19].mxu1 }
 0x52d   :  { %v2429_v35 = vrot.slane %v2421_v26, %v3278_v33  ;;  %v2436_v36 = vrot.slane %v2422_v27, %v3278_v33  ;;  %v2445_v37 = vrot.slane %v2437_v28, %v3278_v33  ;;  %v2452_v39 = vrot.slane %v2438_v31, %v3278_v33 }
 0x52f   :  { %v2453_v30 = vcombine.low %v2429_v35, %v2445_v37  ;;  %v2454_v43 = vcombine.high %v2429_v35, %v2445_v37  ;;  %v2469_v41 = vcombine.low %v2436_v36, %v2452_v39  ;;  %v2470_v53 = vcombine.high %v2436_v36, %v2452_v39  ;;  %2635 = vrot.lane.b32.xlu0 %v2555_v22, %s3134_s11 }
 0x531   :  { %v2461_v20 = vrot.slane %v2453_v30, %v3281_v40  ;;  %v2468_v47 = vrot.slane %v2454_v43, %v3281_v40  ;;  %v2477_v42 = vrot.slane %v2469_v41, %v3281_v40  ;;  %v2484_v9 = vrot.slane %v2470_v53, %v3281_v40 }
 0x533   :  { %2643 = vrot.lane.b32.xlu0 %v2556_v12, %s3135_s12  ;;  %v2557_v13 = vcombine.low %v2461_v20, %v2468_v47  ;;  %v2810_v25 = vcombine.high %v2461_v20, %v2468_v47  ;;  %v2573_v29 = vcombine.low %v2477_v42, %v2484_v9  ;;  %v2811_v45 = vcombine.high %v2477_v42, %v2484_v9 }
 0x535   :  { %v2564_v48 = vrot.slane %v2557_v13, %v3278_v33  ;;  %v2572_v49 = vrot.slane %v2810_v25, %v3278_v33  ;;  %v2580_v50 = vrot.slane %v2573_v29, %v3278_v33  ;;  %v2588_v51 = vrot.slane %v2811_v45, %v3278_v33 }
 0x537   :  { %v2589_v38 = vcombine.low %v2564_v48, %v2572_v49  ;;  %v2605_v54 = vcombine.low %v2580_v50, %v2588_v51  ;;  %v2590_v55 = vcombine.high %v2564_v48, %v2572_v49  ;;  %v2606_v56 = vcombine.high %v2580_v50, %v2588_v51 }
 0x539   :  { %v2597_v57 = vrot.slane %v2589_v38, %v3281_v40  ;;  %v2613_v58 = vrot.slane %v2605_v54, %v3281_v40  ;;  %v2604_v59 = vrot.slane %v2590_v55, %v3281_v40  ;;  %v2620_v60 = vrot.slane %v2606_v56, %v3281_v40 }
 0x53b   :  { %v2622_v61 = vcombine.high %v2597_v57, %v2613_v58  ;;  %v2621_v62 = vcombine.low %v2597_v57, %v2613_v58  ;;  %v2623_v63 = vcombine.low %v2604_v59, %v2620_v60  ;;  %v2624_v33 = vcombine.high %v2604_v59, %v2620_v60 }
 0x53d   :  { %2629 = vrot.lane.b32.xlu1 %v2622_v61, %s3123_s6 }
 0x541   :  { %2637 = vrot.lane.b32.xlu1 %v2623_v63, %s3134_s11 }
 0x545   :  { %2645 = vrot.lane.b32.xlu1 %v2624_v33, %s3135_s12 }
 0x59d   :  { %v2628_v0 = vpop.permute.xlu0 %2627 }
 0x59e   :  { %v2649_v40 = vsel %vm1057_vm2, %v2553_v14, %v2628_v0 }
 0x5a1   :  { %v2636_v2 = vpop.permute.xlu0 %2635 }
 0x5a2   :  { %v2652_v3 = vsel %vm2651_vm4, %v2649_v40, %v2636_v2 }
 0x5a5   :  { %v2644_v1 = vpop.permute.xlu0 %2643 }
 0x5a6   :  { %v2655_v4 = vsel %vm2654_vm5, %v2652_v3, %v2644_v1 }
 0x5a7   :  { %2958 = vmatprep.mubr.msk.f32.mxu0 %vm75_vm0, %v2655_v4 }
 0x5af   :  { %v2630_v5 = vpop.permute.xlu1 %2629 }
 0x5b0   :  { %v2650_v6 = vsel %vm1057_vm2, %v2621_v62, %v2630_v5 }
 0x5b3   :  { %v2638_v21 = vpop.permute.xlu1 %2637 }
 0x5b4   :  { %v2653_v7 = vsel %vm2651_vm4, %v2650_v6, %v2638_v21 }
 0x5b7   :  { %v2646_v16 = vpop.permute.xlu1 %2645 }
 0x5b8   :  { %v2656_v11 = vsel %vm2654_vm5, %v2653_v7, %v2646_v16 }
 0x5b9   :  { %2959 = vmatmul.mubr.msk.f32.vlgmr.msra.gmra.mrb[14].mxu0 %vm75_vm0, %v2656_v11 }
 0x68c   :  { %v2960_v10 = vpop.f32.mrb[14].mxu0 }
 0x68d   :  { %v2746_v15 = vadd.f32 %v2960_v10, %v2812_v8  ;;  %v2740_v14 = vpop.f32.mrb[15].mxu0 }
 0x68e   :  { %v2741_v22 = vadd.f32 %v2812_v8, %v2740_v14 }
 0x68f   :  { %2750 = vst.msk [vmem:[#allocation8 + $0x8] sm:$0xff] %vm75_vm0, %v2746_v15 }
 0x690   :  { %2749 = vst.msk [vmem:[#allocation8] sm:$0xff] %vm75_vm0, %v2741_v22 }
 0x691   :  { %3103 = shalt.err (!%p3100_p0)
}
 0x692   :  { %s3104_s18 = scalar_lea.hbm %s3639_s5, 256 }
 0x693   :  { %p3105_p1 = scmp.ne.s32.totalorder %s3639_s5, %s3104_s18  ;;  %p3108_p2 = scmp.lt.u32.totalorder %s3104_s18, %s3639_s5 }
 0x695   :  { %p3110_p3 = pnand %p3108_p2, %p3105_p1 }
 0x697   :  { %3113 = shalt.err (!%p3110_p3)
}
 0x698   :  { %2762 = dma.vmem_to_hbm [thread:$0]  %s2757_s16, 256, %s3639_s5, [#allocation4], %s3122_s30, %s3122_s30, %s3123_s6  }
 0x699   :  { %3118 = dma.done.wait [#allocation4], 256  }
 0x69a   :  { %3119 = vsyncadd [#allocation4], 4294967040 }
 0x69b   :  { %2766 = vsyncpa [#allocation3], 1 }
 0x69c   :  { %2767 = vsyncpa [#allocation6], 1 }
 0x69d   :  { %2768 = vsyncpa [#allocation4], 1 }

</bundles_post_ra>
